<compile_context>
chip_gen: v5e
topology: v5e:2x2
jax: 0.10.0
libtpu: 0.0.40
codegen_flags: <defaults>
</compile_context>

<pallas_src>
import functools
import math

import jax
import jax.numpy as jnp
from jax import lax
from jax.experimental import pallas as pl
from jax.experimental.pallas import tpu as pltpu

LEAK = 0.2
BN_EPS = 1e-5


def _lrelu(x):
    return jnp.maximum(x, LEAK * x)


def _make_kernel(B, Lq):
    """Fused forward kernel for one grid step of B batch elements (M = B*Lq rows)."""
    M = B * Lq

    def kernel(x0_ref, w0_ref, b0_ref, w1_ref, d1_ref, w2_ref, d2_ref,
               weff_ref, sel_ref, cl_ref, out_ref):
        f32 = jnp.float32
        two_ndf = w0_ref.shape[1]          # 2*ndf = 128
        ndf = two_ndf // 2

        def mm(x, w_ref):
            return jnp.dot(x.astype(w_ref.dtype), w_ref[...],
                           preferred_element_type=f32)

        # ---- hoisted index constants: one sublane iota + one lane iota, reused ------
        row = lax.broadcasted_iota(jnp.int32, (M, 1), 0) % Lq
        not_first = row != 0
        not_last1 = row != (Lq - 1)
        not_last2 = row < (Lq - 2)
        lane_lo = lax.broadcasted_iota(jnp.int32, (1, two_ndf), 1) < ndf

        def shift_dn(z):                   # z[r-1] within each length-Lq batch segment
            return jnp.where(not_first, pltpu.roll(z, 1, axis=0), 0.0)

        def shift_up(z, n, keep):          # z[r+n] within each segment (zero-padded)
            return jnp.where(keep, pltpu.roll(z, M - n, axis=0), 0.0)

        # ---- layer 0: Conv1d(Cin,64,k=4,s=2,p=1) + LeakyReLU -------------------------
        # Glue packed 6-tap windows; W0' emits odd phase in lanes [0,64), even in [64,128).
        y0 = _lrelu(mm(x0_ref[0], w0_ref) + b0_ref[...])            # (M, 128) f32

        # ---- layer 1: Conv1d(64,128,k=4,s=2,p=1) + BN + LeakyReLU (BN folded) --------
        # x1 columns = [y0_odd[u-1] | y0_even[u+1] | y0_odd[u] | y0_even[u]];
        # W1 rows were permuted in glue to match.
        x1a = jnp.where(lane_lo, shift_dn(y0), shift_up(y0, 1, not_last1))
        x1 = jnp.concatenate([x1a, y0], axis=1)                      # (M, 256)
        y1 = _lrelu(mm(x1, w1_ref) + d1_ref[...])                    # (M, 128) f32

        # ---- layer 2: Conv1d(128,256,k=4,s=1,'same') + BN + LeakyReLU ----------------
        x2 = jnp.concatenate(
            [shift_dn(y1), y1, shift_up(y1, 1, not_last1), shift_up(y1, 2, not_last2)],
            axis=1)                                                  # (M, 512)
        y2 = _lrelu(mm(x2, w2_ref) + d2_ref[...])                    # (M, 256) f32

        # ---- layer 3 Conv(256->1,'same') + flatten + Linear(Lq,1) + Sigmoid ----------
        # Folded in glue into W_eff (per-row weights) + scalar bias; lane-reduce to
        # (M,1) then a tiny segment-sum dot against the hoisted 0/1 selector.
        rowdot = jnp.sum(y2 * weff_ref[...], axis=1, keepdims=True)  # (M, 1)
        logit = jnp.dot(sel_ref[...], rowdot,
                        preferred_element_type=f32) + cl_ref[...]    # (B, 1)
        e = jnp.exp(-jnp.abs(logit))                                 # stable sigmoid
        out_ref[0] = jnp.where(logit >= 0, 1.0 / (1.0 + e), e / (1.0 + e))

    return kernel


@functools.partial(jax.jit, static_argnames=("batch_tile", "use_bf16"))
def d_patchgan_forward(x, params, *, batch_tile=None, use_bf16=True):
    """x: (N, C_in, L) float32, PyTorch NCL layout.  Returns sigmoid scores (N, 1)."""
    N, Cin, L = x.shape
    assert L % 4 == 0, "input length must be divisible by 4"
    Lq = L // 4                                   # == linear_size of the module
    f32 = jnp.float32
    mm_dtype = jnp.bfloat16 if use_bf16 else f32

    # ---------------- batch tiling -------------------------------------------------
    if batch_tile is None:
        bt = min(N, max(1, 1024 // Lq))           # target ~<=1024 matmul rows per step
        # Prefer >=2 grid steps (v7x has two TensorCores and only the "parallel" axis
        # is sharded across them), but only if each step still has >=256 rows;
        # otherwise one fat step (best for single-TC v5e/v6e).
        if bt >= N and N > 1 and ((N + 1) // 2) * Lq >= 256:
            bt = (N + 1) // 2
        batch_tile = bt
    row_mult = 16 if use_bf16 else 8              # sublane / bf16 row-packing granularity
    step = row_mult // math.gcd(Lq, row_mult)
    B = max(1, -(-batch_tile // step) * step)     # round up so M is a multiple of row_mult
    n_steps = pl.cdiv(N, B)
    N_pad = n_steps * B
    M = B * Lq
    K0 = 6 * Cin

    # ------------- glue: 6-tap im2col (both layer-0 output phases share one window) --
    x_nlc = jnp.transpose(x, (0, 2, 1)).astype(mm_dtype)             # (N, L, Cin)
    xp = jnp.pad(x_nlc, ((0, 0), (1, 1), (0, 0)))                    # conv pad = 1
    X0 = jnp.concatenate([xp[:, j::4, :][:, :Lq, :] for j in range(6)], axis=-1)
    if N_pad != N:
        X0 = jnp.pad(X0, ((0, N_pad - N), (0, 0), (0, 0)))
    X0 = X0.reshape(n_steps, M, K0)                                  # (steps, B*Lq, 6*Cin)

    # ------------- glue: weight preprocessing ----------------------------------------
    def taps(w):                  # PyTorch Conv1d weight (Cout, Cin, K) -> (K*Cin, Cout)
        Cout, Ci, K = w.shape
        return jnp.transpose(w, (2, 1, 0)).reshape(K * Ci, Cout).astype(f32)

    def bn_fold(w_km, b, g, beta, m, v):          # fold eval-mode BN into weight + bias
        a = g.astype(f32) / jnp.sqrt(v.astype(f32) + BN_EPS)
        c = beta.astype(f32) - m.astype(f32) * a
        return w_km * a[None, :], (b.astype(f32) * a + c).reshape(1, -1)

    ndf = params['w0'].shape[0]                                      # 64
    W0t = taps(params['w0'])                                         # (4*Cin, ndf)
    zblk = jnp.zeros((2 * Cin, ndf), f32)
    # dual-phase layer-0 weight: odd outputs -> lanes [0,ndf), even -> [ndf,2*ndf)
    W0p = jnp.concatenate([jnp.concatenate([zblk, W0t], axis=0),
                           jnp.concatenate([W0t, zblk], axis=0)], axis=1)  # (6Cin, 2ndf)
    b0 = params['b0'].astype(f32)
    b0p = jnp.concatenate([b0, b0]).reshape(1, -1)                   # (1, 2*ndf)

    # layer-1 weight rows regrouped to the in-kernel x1 column order [tap0,tap3,tap2,tap1]
    W1t = taps(params['w1'])                                         # (4*ndf, 128)
    W1t = W1t.reshape(4, ndf, -1)[jnp.array([0, 3, 2, 1])].reshape(4 * ndf, -1)
    W1p, d1 = bn_fold(W1t, params['b1'], params['bn1_g'], params['bn1_b'],
                      params['bn1_m'], params['bn1_v'])
    W2p, d2 = bn_fold(taps(params['w2']), params['b2'], params['bn2_g'],
                      params['bn2_b'], params['bn2_m'], params['bn2_v'])

    # Fold Conv1d(256,1,k=4,'same') + flatten + Linear(Lq,1) into W_eff (Lq,256) + const.
    wl_vec = params['wl'].reshape(-1).astype(f32)                    # (Lq,)
    w3t = jnp.transpose(params['w3'], (2, 1, 0))[:, :, 0].astype(f32)  # (4, 256)
    C2 = w3t.shape[1]
    v_idx = jnp.arange(Lq)
    W_eff = jnp.zeros((Lq, C2), f32)
    for k in range(4):
        t = v_idx + 1 - k
        coef = jnp.where((t >= 0) & (t < Lq), wl_vec[jnp.clip(t, 0, Lq - 1)], 0.0)
        W_eff = W_eff + coef[:, None] * w3t[k][None, :]
    weff_t = jnp.tile(W_eff, (B, 1))                                 # (M, 256), grid-invariant
    cl = (params['b3'].astype(f32).sum() * wl_vec.sum()
          + params['bl'].astype(f32).sum()).reshape(1, 1)
    # hoisted 0/1 per-batch segment selector (grid-invariant)
    sel = (jnp.arange(M, dtype=jnp.int32)[None, :] // Lq
           == jnp.arange(B, dtype=jnp.int32)[:, None]).astype(f32)   # (B, M)

    args = (X0, W0p.astype(mm_dtype), b0p, W1p.astype(mm_dtype), d1,
            W2p.astype(mm_dtype), d2, weff_t, sel, cl)

    def full_spec(arr):
        nd = arr.ndim
        return pl.BlockSpec(arr.shape, lambda g, _nd=nd: (0,) * _nd)

    in_specs = [pl.BlockSpec((1, M, K0), lambda g: (g, 0, 0))]
    in_specs += [full_spec(a) for a in args[1:]]

    # VMEM budget: streamed X0 block (double-buffered) + f32 intermediates + weights.
    itm = 2 if use_bf16 else 4
    est = (2 * M * K0 * itm
           + M * (128 + 256 + 128 + 512 + 256) * 4
           + (K0 * 2 * ndf + 4 * ndf * 2 * ndf + 8 * ndf * 4 * ndf) * itm
           + (M * C2 + B * M) * 4)
    vmem_limit = int(min(48 * 2 ** 20, max(32 * 2 ** 20, 2 * est)))

    out = pl.pallas_call(
        _make_kernel(B, Lq),
        out_shape=jax.ShapeDtypeStruct((n_steps, B, 1), f32),
        grid=(n_steps,),
        in_specs=in_specs,
        out_specs=pl.BlockSpec((1, B, 1), lambda g: (g, 0, 0)),
        compiler_params=pltpu.CompilerParams(
            dimension_semantics=("parallel",),        # batch steps are independent
            vmem_limit_bytes=vmem_limit),
    )(*args)
    return out.reshape(N_pad, 1)[:N]


def _reference(x, params):
    """Plain-JAX reference of the PyTorch forward pass (for verification)."""
    f32 = jnp.float32
    x = x.astype(f32)

    def conv1d(y, w, b, stride, pad):
        out = lax.conv_general_dilated(
            y, w.astype(f32), window_strides=(stride,), padding=[pad],
            dimension_numbers=('NCH', 'OIH', 'NCH'))
        return out + b.astype(f32)[None, :, None]

    def bn(y, g, b, m, v):
        return (y - m[None, :, None]) / jnp.sqrt(v[None, :, None] + BN_EPS) \
            * g[None, :, None] + b[None, :, None]

    def lrelu(y):
        return jnp.where(y >= 0, y, LEAK * y)

    y = lrelu(conv1d(x, params['w0'], params['b0'], 2, (1, 1)))
    y = lrelu(bn(conv1d(y, params['w1'], params['b1'], 2, (1, 1)),
                 params['bn1_g'], params['bn1_b'], params['bn1_m'], params['bn1_v']))
    y = lrelu(bn(conv1d(y, params['w2'], params['b2'], 1, (1, 2)),
                 params['bn2_g'], params['bn2_b'], params['bn2_m'], params['bn2_v']))
    y = conv1d(y, params['w3'], params['b3'], 1, (1, 2))
    flat = y.reshape(y.shape[0], -1)                 # rearrange 'b l f -> b (l f)'
    return jax.nn.sigmoid(flat @ params['wl'].T.astype(f32) + params['bl'][None, :])


def _make_params(key, Cin, Lq):
    ks = jax.random.split(key, 20)

    def nrm(k, shape, s=0.1):
        return (jax.random.normal(k, shape) * s).astype(jnp.float32)

    return {
        'w0': nrm(ks[0], (64, Cin, 4)), 'b0': nrm(ks[1], (64,)),
        'w1': nrm(ks[2], (128, 64, 4), 0.05), 'b1': nrm(ks[3], (128,)),
        'bn1_g': (1.0 + nrm(ks[4], (128,))), 'bn1_b': nrm(ks[5], (128,)),
        'bn1_m': nrm(ks[6], (128,)),
        'bn1_v': jax.random.uniform(ks[7], (128,), minval=0.5, maxval=1.5).astype(jnp.float32),
        'w2': nrm(ks[8], (256, 128, 4), 0.05), 'b2': nrm(ks[9], (256,)),
        'bn2_g': (1.0 + nrm(ks[10], (256,))), 'bn2_b': nrm(ks[11], (256,)),
        'bn2_m': nrm(ks[12], (256,)),
        'bn2_v': jax.random.uniform(ks[13], (256,), minval=0.5, maxval=1.5).astype(jnp.float32),
        'w3': nrm(ks[14], (1, 256, 4), 0.05), 'b3': nrm(ks[15], (1,)),
        'wl': nrm(ks[16], (1, Lq)), 'bl': nrm(ks[17], (1,)),
    }


if __name__ == "__main__":
    key = jax.random.PRNGKey(0)
    k1, k2, kx1, kx2 = jax.random.split(key, 4)

    # ---- config 1: N=2, Cin=4, L=32 (Lq = linear_size = 8) -------------------------
    N, Cin, L = 2, 4, 32
    params = _make_params(k1, Cin, L // 4)
    x = jax.random.normal(kx1, (N, Cin, L)).astype(jnp.float32)
    ref = jax.block_until_ready(_reference(x, params))

    # exact-math path (f32 matmuls), default batch tiling
    out_f32 = jax.block_until_ready(d_patchgan_forward(x, params, use_bf16=False))
    assert out_f32.shape == (N, 1), out_f32.shape
    assert jnp.allclose(out_f32, ref, atol=1e-4, rtol=1e-4), (out_f32, ref)

    # one batch element per grid step (multi-step grid path)
    out_split = jax.block_until_ready(
        d_patchgan_forward(x, params, use_bf16=False, batch_tile=1))
    assert jnp.allclose(out_split, ref, atol=1e-4, rtol=1e-4), (out_split, ref)

    # padded-batch path (batch_tile > N)
    out_pad = jax.block_until_ready(
        d_patchgan_forward(x, params, use_bf16=False, batch_tile=3))
    assert jnp.allclose(out_pad, ref, atol=1e-4, rtol=1e-4), (out_pad, ref)

    # fast path: bf16 matmul inputs with f32 accumulation
    out_bf16 = jax.block_until_ready(d_patchgan_forward(x, params, use_bf16=True))
    assert out_bf16.shape == (N, 1), out_bf16.shape
    assert jnp.allclose(out_bf16, ref, atol=2e-2, rtol=0.0), (out_bf16, ref)

    # ---- config 2: N=3, Cin=6, L=16 (Lq=4; exercises batch rounding / small Lq) ----
    N2, Cin2, L2 = 3, 6, 16
    params2 = _make_params(k2, Cin2, L2 // 4)
    x2 = jax.random.normal(kx2, (N2, Cin2, L2)).astype(jnp.float32)
    ref2 = jax.block_until_ready(_reference(x2, params2))
    out2 = jax.block_until_ready(d_patchgan_forward(x2, params2, use_bf16=False))
    assert out2.shape == (N2, 1), out2.shape
    assert jnp.allclose(out2, ref2, atol=1e-4, rtol=1e-4), (out2, ref2)

    print("KERNEL_OK")
</pallas_src>

<mosaic_0001>
module attributes {stable_mosaic.version = 11 : i64} {
  func.func @kernel(%arg0: i32, %arg1: memref<1x16x24xf32, #tpu.memory_space<vmem>>, %arg2: memref<24x128xf32, #tpu.memory_space<vmem>>, %arg3: memref<1x128xf32, #tpu.memory_space<vmem>>, %arg4: memref<256x128xf32, #tpu.memory_space<vmem>>, %arg5: memref<1x128xf32, #tpu.memory_space<vmem>>, %arg6: memref<512x256xf32, #tpu.memory_space<vmem>>, %arg7: memref<1x256xf32, #tpu.memory_space<vmem>>, %arg8: memref<16x256xf32, #tpu.memory_space<vmem>>, %arg9: memref<2x16xf32, #tpu.memory_space<vmem>>, %arg10: memref<1x1xf32, #tpu.memory_space<vmem>>, %arg11: memref<1x2x1xf32, #tpu.memory_space<vmem>>) attributes {dimension_semantics = [#tpu.dimension_semantics<parallel>], iteration_bounds = array<i64: 1>, scalar_prefetch = 0 : i64, scratch_operands = 0 : i64, tpu.core_type = #tpu.core_type<tc>, window_params = [{transform_indices = @transform_0, window_bounds = array<i64: 1, 16, 24>}, {pipeline_mode = #tpu.pipeline_mode<synchronous>, transform_indices = @transform_1, window_bounds = array<i64: 24, 128>}, {pipeline_mode = #tpu.pipeline_mode<synchronous>, transform_indices = @transform_2, window_bounds = array<i64: 1, 128>}, {pipeline_mode = #tpu.pipeline_mode<synchronous>, transform_indices = @transform_3, window_bounds = array<i64: 256, 128>}, {pipeline_mode = #tpu.pipeline_mode<synchronous>, transform_indices = @transform_4, window_bounds = array<i64: 1, 128>}, {pipeline_mode = #tpu.pipeline_mode<synchronous>, transform_indices = @transform_5, window_bounds = array<i64: 512, 256>}, {pipeline_mode = #tpu.pipeline_mode<synchronous>, transform_indices = @transform_6, window_bounds = array<i64: 1, 256>}, {pipeline_mode = #tpu.pipeline_mode<synchronous>, transform_indices = @transform_7, window_bounds = array<i64: 16, 256>}, {pipeline_mode = #tpu.pipeline_mode<synchronous>, transform_indices = @transform_8, window_bounds = array<i64: 2, 16>}, {pipeline_mode = #tpu.pipeline_mode<synchronous>, transform_indices = @transform_9, window_bounds = array<i64: 1, 1>}, {transform_indices = @transform_10, window_bounds = array<i64: 1, 2, 1>}]} {
    %0 = tpu.iota {dimensions = array<i32: 0>} : vector<16x1xi32>
    %c8_i32 = arith.constant 8 : i32
    %c0_i32 = arith.constant 0 : i32
    %1 = arith.cmpi eq, %c8_i32, %c0_i32 : i32
    %c1_i32 = arith.constant 1 : i32
    %2 = arith.select %1, %c1_i32, %c8_i32 : i32
    %3 = vector.broadcast %2 : i32 to vector<16x1xi32>
    %4 = arith.remsi %0, %3 : vector<16x1xi32>
    %c0_i32_0 = arith.constant 0 : i32
    %5 = vector.broadcast %c0_i32_0 : i32 to vector<16x1xi32>
    %6 = arith.cmpi ne, %4, %5 : vector<16x1xi32>
    %c0_i32_1 = arith.constant 0 : i32
    %7 = vector.broadcast %c0_i32_1 : i32 to vector<16x1xi32>
    %8 = arith.cmpi slt, %4, %7 : vector<16x1xi32>
    %c0_i32_2 = arith.constant 0 : i32
    %9 = arith.cmpi slt, %2, %c0_i32_2 : i32
    %10 = vector.broadcast %9 : i1 to vector<16x1xi1>
    %11 = vector.broadcast %10 : vector<16x1xi1> to vector<16x1xi1>
    %12 = arith.xori %8, %11 : vector<16x1xi1>
    %13 = arith.andi %12, %6 : vector<16x1xi1>
    %14 = vector.broadcast %2 : i32 to vector<16x1xi32>
    %15 = arith.addi %4, %14 : vector<16x1xi32>
    %16 = arith.select %13, %15, %4 : vector<16x1xi1>, vector<16x1xi32>
    %c0_i32_3 = arith.constant 0 : i32
    %17 = vector.broadcast %c0_i32_3 : i32 to vector<16x1xi32>
    %18 = arith.cmpi ne, %16, %17 : vector<16x1xi32>
    %c7_i32 = arith.constant 7 : i32
    %19 = vector.broadcast %c7_i32 : i32 to vector<16x1xi32>
    %20 = arith.cmpi ne, %16, %19 : vector<16x1xi32>
    %c6_i32 = arith.constant 6 : i32
    %21 = vector.broadcast %c6_i32 : i32 to vector<16x1xi32>
    %22 = arith.cmpi slt, %16, %21 : vector<16x1xi32>
    %23 = tpu.iota {dimensions = array<i32: 1>} : vector<1x128xi32>
    %c64_i32 = arith.constant 64 : i32
    %24 = vector.broadcast %c64_i32 : i32 to vector<1x128xi32>
    %25 = arith.cmpi slt, %23, %24 : vector<1x128xi32>
    %c0 = arith.constant 0 : index
    %c0_4 = arith.constant 0 : index
    %c0_5 = arith.constant 0 : index
    %26 = vector.load %arg1[%c0, %c0_4, %c0_5] : memref<1x16x24xf32, #tpu.memory_space<vmem>>, vector<1x16x24xf32>
    %27 = vector.shape_cast %26 : vector<1x16x24xf32> to vector<16x24xf32>
    %c0_6 = arith.constant 0 : index
    %c0_7 = arith.constant 0 : index
    %28 = vector.load %arg2[%c0_6, %c0_7] : memref<24x128xf32, #tpu.memory_space<vmem>>, vector<24x128xf32>
    %cst = arith.constant dense<0.000000e+00> : vector<16x128xf32>
    %29 = tpu.matmul %27, %28, %cst {dimension_numbers = #tpu.dot_dimension_numbers<[1], [0], [0], [1], [0, 0, 1, 1], [], []>} : vector<16x24xf32>, vector<24x128xf32>, vector<16x128xf32> -> vector<16x128xf32>
    %c0_8 = arith.constant 0 : index
    %c0_9 = arith.constant 0 : index
    %30 = vector.load %arg3[%c0_8, %c0_9] : memref<1x128xf32, #tpu.memory_space<vmem>>, vector<1x128xf32>
    %31 = vector.broadcast %30 : vector<1x128xf32> to vector<16x128xf32>
    %32 = arith.addf %29, %31 : vector<16x128xf32>
    %cst_10 = arith.constant 2.000000e-01 : f32
    %33 = vector.broadcast %cst_10 : f32 to vector<16x128xf32>
    %34 = arith.mulf %33, %32 : vector<16x128xf32>
    %35 = arith.maximumf %32, %34 : vector<16x128xf32>
    %c1_i32_11 = arith.constant 1 : i32
    %36 = tpu.dynamic_rotate %35 by %c1_i32_11 dim 0 : vector<16x128xf32>, i32 -> vector<16x128xf32>
    %cst_12 = arith.constant 0.000000e+00 : f32
    %37 = vector.shape_cast %18 : vector<16x1xi1> to vector<16x1xi1>
    %38 = vector.broadcast %37 : vector<16x1xi1> to vector<16x128xi1>
    %39 = vector.broadcast %cst_12 : f32 to vector<16x128xf32>
    %40 = arith.select %38, %36, %39 : vector<16x128xi1>, vector<16x128xf32>
    %c15_i32 = arith.constant 15 : i32
    %41 = tpu.dynamic_rotate %35 by %c15_i32 dim 0 : vector<16x128xf32>, i32 -> vector<16x128xf32>
    %cst_13 = arith.constant 0.000000e+00 : f32
    %42 = vector.shape_cast %20 : vector<16x1xi1> to vector<16x1xi1>
    %43 = vector.broadcast %42 : vector<16x1xi1> to vector<16x128xi1>
    %44 = vector.broadcast %cst_13 : f32 to vector<16x128xf32>
    %45 = arith.select %43, %41, %44 : vector<16x128xi1>, vector<16x128xf32>
    %46 = vector.shape_cast %25 : vector<1x128xi1> to vector<1x128xi1>
    %47 = vector.broadcast %46 : vector<1x128xi1> to vector<16x128xi1>
    %48 = arith.select %47, %40, %45 : vector<16x128xi1>, vector<16x128xf32>
    %49 = tpu.concatenate %48, %35 in 1 : vector<16x128xf32>, vector<16x128xf32> -> vector<16x256xf32>
    %c0_14 = arith.constant 0 : index
    %c0_15 = arith.constant 0 : index
    %50 = vector.load %arg4[%c0_14, %c0_15] : memref<256x128xf32, #tpu.memory_space<vmem>>, vector<256x128xf32>
    %cst_16 = arith.constant dense<0.000000e+00> : vector<16x128xf32>
    %51 = tpu.matmul %49, %50, %cst_16 {dimension_numbers = #tpu.dot_dimension_numbers<[1], [0], [0], [1], [0, 0, 1, 1], [], []>} : vector<16x256xf32>, vector<256x128xf32>, vector<16x128xf32> -> vector<16x128xf32>
    %c0_17 = arith.constant 0 : index
    %c0_18 = arith.constant 0 : index
    %52 = vector.load %arg5[%c0_17, %c0_18] : memref<1x128xf32, #tpu.memory_space<vmem>>, vector<1x128xf32>
    %53 = vector.broadcast %52 : vector<1x128xf32> to vector<16x128xf32>
    %54 = arith.addf %51, %53 : vector<16x128xf32>
    %cst_19 = arith.constant 2.000000e-01 : f32
    %55 = vector.broadcast %cst_19 : f32 to vector<16x128xf32>
    %56 = arith.mulf %55, %54 : vector<16x128xf32>
    %57 = arith.maximumf %54, %56 : vector<16x128xf32>
    %c1_i32_20 = arith.constant 1 : i32
    %58 = tpu.dynamic_rotate %57 by %c1_i32_20 dim 0 : vector<16x128xf32>, i32 -> vector<16x128xf32>
    %cst_21 = arith.constant 0.000000e+00 : f32
    %59 = vector.shape_cast %18 : vector<16x1xi1> to vector<16x1xi1>
    %60 = vector.broadcast %59 : vector<16x1xi1> to vector<16x128xi1>
    %61 = vector.broadcast %cst_21 : f32 to vector<16x128xf32>
    %62 = arith.select %60, %58, %61 : vector<16x128xi1>, vector<16x128xf32>
    %c15_i32_22 = arith.constant 15 : i32
    %63 = tpu.dynamic_rotate %57 by %c15_i32_22 dim 0 : vector<16x128xf32>, i32 -> vector<16x128xf32>
    %cst_23 = arith.constant 0.000000e+00 : f32
    %64 = vector.shape_cast %20 : vector<16x1xi1> to vector<16x1xi1>
    %65 = vector.broadcast %64 : vector<16x1xi1> to vector<16x128xi1>
    %66 = vector.broadcast %cst_23 : f32 to vector<16x128xf32>
    %67 = arith.select %65, %63, %66 : vector<16x128xi1>, vector<16x128xf32>
    %c14_i32 = arith.constant 14 : i32
    %68 = tpu.dynamic_rotate %57 by %c14_i32 dim 0 : vector<16x128xf32>, i32 -> vector<16x128xf32>
    %cst_24 = arith.constant 0.000000e+00 : f32
    %69 = vector.shape_cast %22 : vector<16x1xi1> to vector<16x1xi1>
    %70 = vector.broadcast %69 : vector<16x1xi1> to vector<16x128xi1>
    %71 = vector.broadcast %cst_24 : f32 to vector<16x128xf32>
    %72 = arith.select %70, %68, %71 : vector<16x128xi1>, vector<16x128xf32>
    %73 = tpu.concatenate %62, %57, %67, %72 in 1 : vector<16x128xf32>, vector<16x128xf32>, vector<16x128xf32>, vector<16x128xf32> -> vector<16x512xf32>
    %c0_25 = arith.constant 0 : index
    %c0_26 = arith.constant 0 : index
    %74 = vector.load %arg6[%c0_25, %c0_26] : memref<512x256xf32, #tpu.memory_space<vmem>>, vector<512x256xf32>
    %cst_27 = arith.constant dense<0.000000e+00> : vector<16x256xf32>
    %75 = tpu.matmul %73, %74, %cst_27 {dimension_numbers = #tpu.dot_dimension_numbers<[1], [0], [0], [1], [0, 0, 1, 1], [], []>} : vector<16x512xf32>, vector<512x256xf32>, vector<16x256xf32> -> vector<16x256xf32>
    %c0_28 = arith.constant 0 : index
    %c0_29 = arith.constant 0 : index
    %76 = vector.load %arg7[%c0_28, %c0_29] : memref<1x256xf32, #tpu.memory_space<vmem>>, vector<1x256xf32>
    %77 = vector.broadcast %76 : vector<1x256xf32> to vector<16x256xf32>
    %78 = arith.addf %75, %77 : vector<16x256xf32>
    %cst_30 = arith.constant 2.000000e-01 : f32
    %79 = vector.broadcast %cst_30 : f32 to vector<16x256xf32>
    %80 = arith.mulf %79, %78 : vector<16x256xf32>
    %81 = arith.maximumf %78, %80 : vector<16x256xf32>
    %c0_31 = arith.constant 0 : index
    %c0_32 = arith.constant 0 : index
    %82 = vector.load %arg8[%c0_31, %c0_32] : memref<16x256xf32, #tpu.memory_space<vmem>>, vector<16x256xf32>
    %83 = arith.mulf %81, %82 : vector<16x256xf32>
    %cst_33 = arith.constant dense<0.000000e+00> : vector<16xf32>
    %84 = vector.multi_reduction <add>, %83, %cst_33 [1] : vector<16x256xf32> to vector<16xf32>
    %85 = vector.shape_cast %84 : vector<16xf32> to vector<16x1xf32>
    %c0_34 = arith.constant 0 : index
    %c0_35 = arith.constant 0 : index
    %86 = vector.load %arg9[%c0_34, %c0_35] : memref<2x16xf32, #tpu.memory_space<vmem>>, vector<2x16xf32>
    %cst_36 = arith.constant dense<0.000000e+00> : vector<2x1xf32>
    %87 = tpu.matmul %86, %85, %cst_36 {dimension_numbers = #tpu.dot_dimension_numbers<[1], [0], [0], [1], [0, 0, 1, 1], [], []>} : vector<2x16xf32>, vector<16x1xf32>, vector<2x1xf32> -> vector<2x1xf32>
    %c0_37 = arith.constant 0 : index
    %c0_38 = arith.constant 0 : index
    %88 = vector.load %arg10[%c0_37, %c0_38] : memref<1x1xf32, #tpu.memory_space<vmem>>, vector<1x1xf32>
    %89 = vector.broadcast %88 : vector<1x1xf32> to vector<2x1xf32>
    %90 = arith.addf %87, %89 : vector<2x1xf32>
    %91 = math.absf %90 : vector<2x1xf32>
    %cst_39 = arith.constant 0.000000e+00 : f32
    %92 = vector.broadcast %cst_39 : f32 to vector<2x1xf32>
    %93 = arith.subf %92, %91 : vector<2x1xf32>
    %94 = math.exp %93 : vector<2x1xf32>
    %cst_40 = arith.constant 0.000000e+00 : f32
    %95 = vector.broadcast %cst_40 : f32 to vector<2x1xf32>
    %96 = arith.cmpf oge, %90, %95 : vector<2x1xf32>
    %cst_41 = arith.constant 1.000000e+00 : f32
    %97 = vector.broadcast %cst_41 : f32 to vector<2x1xf32>
    %98 = arith.addf %97, %94 : vector<2x1xf32>
    %cst_42 = arith.constant 1.000000e+00 : f32
    %99 = vector.broadcast %cst_42 : f32 to vector<2x1xf32>
    %100 = arith.divf %99, %98 : vector<2x1xf32>
    %cst_43 = arith.constant 1.000000e+00 : f32
    %101 = vector.broadcast %cst_43 : f32 to vector<2x1xf32>
    %102 = arith.addf %101, %94 : vector<2x1xf32>
    %103 = arith.divf %94, %102 : vector<2x1xf32>
    %104 = arith.select %96, %100, %103 : vector<2x1xi1>, vector<2x1xf32>
    %c0_44 = arith.constant 0 : index
    %c0_45 = arith.constant 0 : index
    %c0_46 = arith.constant 0 : index
    %105 = vector.load %arg11[%c0_44, %c0_45, %c0_46] : memref<1x2x1xf32, #tpu.memory_space<vmem>>, vector<1x2x1xf32>
    %106 = vector.shape_cast %105 : vector<1x2x1xf32> to vector<2x1xf32>
    %107 = vector.shape_cast %104 : vector<2x1xf32> to vector<1x2x1xf32>
    tpu.vector_store %arg11[%c0_44, %c0_45, %c0_46], %107 {strides = array<i32>} : memref<1x2x1xf32, #tpu.memory_space<vmem>>, vector<1x2x1xf32>,
    return
  }
  func.func @transform_0(%arg0: i32) -> (i32, i32, i32) {
    %c0_i32 = arith.constant 0 : i32
    %c0_i32_0 = arith.constant 0 : i32
    %c0_i32_1 = arith.constant 0 : i32
    return %arg0, %c0_i32, %c0_i32_0 : i32, i32, i32
  }
  func.func @transform_1(%arg0: i32) -> (i32, i32) {
    %c0_i32 = arith.constant 0 : i32
    %c0_i32_0 = arith.constant 0 : i32
    %c0_i32_1 = arith.constant 0 : i32
    return %c0_i32, %c0_i32_0 : i32, i32
  }
  func.func @transform_2(%arg0: i32) -> (i32, i32) {
    %c0_i32 = arith.constant 0 : i32
    %c0_i32_0 = arith.constant 0 : i32
    %c0_i32_1 = arith.constant 0 : i32
    return %c0_i32, %c0_i32_0 : i32, i32
  }
  func.func @transform_3(%arg0: i32) -> (i32, i32) {
    %c0_i32 = arith.constant 0 : i32
    %c0_i32_0 = arith.constant 0 : i32
    %c0_i32_1 = arith.constant 0 : i32
    return %c0_i32, %c0_i32_0 : i32, i32
  }
  func.func @transform_4(%arg0: i32) -> (i32, i32) {
    %c0_i32 = arith.constant 0 : i32
    %c0_i32_0 = arith.constant 0 : i32
    %c0_i32_1 = arith.constant 0 : i32
    return %c0_i32, %c0_i32_0 : i32, i32
  }
  func.func @transform_5(%arg0: i32) -> (i32, i32) {
    %c0_i32 = arith.constant 0 : i32
    %c0_i32_0 = arith.constant 0 : i32
    %c0_i32_1 = arith.constant 0 : i32
    return %c0_i32, %c0_i32_0 : i32, i32
  }
  func.func @transform_6(%arg0: i32) -> (i32, i32) {
    %c0_i32 = arith.constant 0 : i32
    %c0_i32_0 = arith.constant 0 : i32
    %c0_i32_1 = arith.constant 0 : i32
    return %c0_i32, %c0_i32_0 : i32, i32
  }
  func.func @transform_7(%arg0: i32) -> (i32, i32) {
    %c0_i32 = arith.constant 0 : i32
    %c0_i32_0 = arith.constant 0 : i32
    %c0_i32_1 = arith.constant 0 : i32
    return %c0_i32, %c0_i32_0 : i32, i32
  }
  func.func @transform_8(%arg0: i32) -> (i32, i32) {
    %c0_i32 = arith.constant 0 : i32
    %c0_i32_0 = arith.constant 0 : i32
    %c0_i32_1 = arith.constant 0 : i32
    return %c0_i32, %c0_i32_0 : i32, i32
  }
  func.func @transform_9(%arg0: i32) -> (i32, i32) {
    %c0_i32 = arith.constant 0 : i32
    %c0_i32_0 = arith.constant 0 : i32
    %c0_i32_1 = arith.constant 0 : i32
    return %c0_i32, %c0_i32_0 : i32, i32
  }
  func.func @transform_10(%arg0: i32) -> (i32, i32, i32) {
    %c0_i32 = arith.constant 0 : i32
    %c0_i32_0 = arith.constant 0 : i32
    %c0_i32_1 = arith.constant 0 : i32
    return %arg0, %c0_i32, %c0_i32_0 : i32, i32, i32
  }
}

</mosaic_0001>

<bundles_post_ra>
// kernel: d_patchgan_forward.1
= control target key start
LH: loop header
LB: loop body
LE: loop exit
PB: predicated region body
PF: predicated region fallthrough
CT: control target
= control target key end

     0   :  { %vm82_vm0 = vcmask 195584   ;;  %v37_v54 = vlaneseq  ;;  %vm596_vm11 = vcmask 130048   ;;  %s1406_s1 = inlined_call_operand.vmem [shape: f32[24,128], index: 1, kind: input, shape index: {}]   ;;  %s1407_s3 = inlined_call_operand.vmem [shape: f32[256,128], index: 3, kind: input, shape index: {}]   ;;  %s1408_s0 = inlined_call_operand.vmem [shape: f32[1,16,24], index: 0, kind: input, shape index: {}]   ;;  %s1409_s2 = inlined_call_operand.vmem [shape: f32[1,128], index: 2, kind: input, shape index: {}]   ;;  %s1410_s5 = inlined_call_operand.vmem [shape: f32[512,256], index: 5, kind: input, shape index: {}]   ;;  %s1411_s4 = inlined_call_operand.vmem [shape: f32[1,128], index: 4, kind: input, shape index: {}]   ;;  %s1412_s6 = inlined_call_operand.vmem [shape: f32[1,256], index: 6, kind: input, shape index: {}]   ;;  %s1413_s7 = inlined_call_operand.vmem [shape: f32[16,256], index: 7, kind: input, shape index: {}]   ;;  %s1414_s9 = inlined_call_operand.<no memory space> [shape: f32[1,1], index: 9, kind: input, shape index: {}]   ;;  %s1415_s8 = inlined_call_operand.vmem [shape: f32[2,16], index: 8, kind: input, shape index: {}]   ;;  %s1416_s10 = inlined_call_operand.vmem [shape: f32[1,2,1], index: 10, kind: output, shape index: {}]  }
   0x1   :  { %v77_v0 = vld [vmem:[%s1406_s1 + $0x10] sm:$0xff]  ;;  %v76_v1 = vld [vmem:[%s1406_s1 + $0x8] sm:$0xff]  ;;  %v173_v2 = vld [vmem:[%s1407_s3 + $0xf8] sm:$0xff] }
   0x2   :  { %102 = vmatpush.msra.mxu0 %v77_v0  ;;  %v75_v3 = vld [vmem:[%s1406_s1] sm:$0xff]  ;;  %201 = vmatpush.msra.mxu2 %v173_v2  ;;  %v172_v4 = vld [vmem:[%s1407_s3 + $0xf0] sm:$0xff]  ;;  %v171_v6 = vld [vmem:[%s1407_s3 + $0xe8] sm:$0xff] }
   0x3   :  { %v73_v5 = vld [vmem:[%s1408_s0] sm:$0xff]  ;;  %v157_v7 = vld [vmem:[%s1407_s3 + $0x78] sm:$0xff]  ;;  %v156_v8 = vld [vmem:[%s1407_s3 + $0x70] sm:$0xff] }
   0x4   :  { %103 = vmatpush.msra.mxu0 %v76_v1  ;;  %202 = vmatpush.msra.mxu2 %v172_v4  ;;  %v170_v9 = vld [vmem:[%s1407_s3 + $0xe0] sm:$0xff]  ;;  %v155_v10 = vld [vmem:[%s1407_s3 + $0x68] sm:$0xff]  ;;  %v169_v11 = vld [vmem:[%s1407_s3 + $0xd8] sm:$0xff]  ;;  %v924_v1 = vshrl.u32 %v37_v54, 7 }
   0x5   :  { %178 = vmatpush.msra.mxu1 %v157_v7  ;;  %v154_v12 = vld [vmem:[%s1407_s3 + $0x60] sm:$0xff]  ;;  %v168_v13 = vld [vmem:[%s1407_s3 + $0xd0] sm:$0xff]  ;;  %v153_v14 = vld [vmem:[%s1407_s3 + $0x58] sm:$0xff] }
   0x6   :  { %104 = vmatpush.msra.mxu0 %v75_v3  ;;  %203 = vmatpush.msra.mxu2 %v171_v6  ;;  %v74_v15 = vld [vmem:[%s1408_s0 + $0x8] sm:$0xff]  ;;  %v152_v17 = vld [vmem:[%s1407_s3 + $0x50] sm:$0xff]  ;;  %v166_v18 = vld [vmem:[%s1407_s3 + $0xc0] sm:$0xff]  ;;  %v939_v7 = vand.u32 7, %v924_v1  ;;  %vm118_vm3 = vcmp.lt.s32.totalorder %v924_v1, 1  ;;  %vm129_vm4 = vcmp.lt.s32.totalorder %v924_v1, 7 }
   0x7   :  { %649 = vmatmul.msk.f32.vlgmr.msra.gmra.mxu0 %vm82_vm0, %v73_v5  ;;  %179 = vmatpush.msra.mxu1 %v156_v8  ;;  %v167_v16 = vld [vmem:[%s1407_s3 + $0xc8] sm:$0xff]  ;;  %v165_v19 = vld [vmem:[%s1407_s3 + $0xb8] sm:$0xff]  ;;  %v164_v20 = vld [vmem:[%s1407_s3 + $0xb0] sm:$0xff]  ;;  %vm242_vm8 = vcmp.lt.s32.totalorder %v924_v1, 6 }
   0x8   :  { %204 = vmatpush.msra.mxu2 %v170_v9  ;;  %v163_v21 = vld [vmem:[%s1407_s3 + $0xa8] sm:$0xff]  ;;  %v162_v22 = vld [vmem:[%s1407_s3 + $0xa0] sm:$0xff]  ;;  %v161_v23 = vld [vmem:[%s1407_s3 + $0x98] sm:$0xff]  ;;  %vm64_vm1 = vcmp.ne.s32.totalorder %v939_v7, 0  ;;  %vm66_vm2 = vcmp.ne.s32.totalorder %v939_v7, 7  ;;  %vm68_vm9 = vcmp.lt.s32.totalorder %v939_v7, 6 }
   0x9   :  { %180 = vmatpush.msra.mxu1 %v155_v10  ;;  %v151_v24 = vld [vmem:[%s1407_s3 + $0x48] sm:$0xff]  ;;  %v160_v25 = vld [vmem:[%s1407_s3 + $0x90] sm:$0xff]  ;;  %v150_v26 = vld [vmem:[%s1407_s3 + $0x40] sm:$0xff] }
   0xa   :  { %205 = vmatpush.msra.mxu2 %v169_v11  ;;  %v159_v27 = vld [vmem:[%s1407_s3 + $0x88] sm:$0xff]  ;;  %v149_v28 = vld [vmem:[%s1407_s3 + $0x38] sm:$0xff]  ;;  %v158_v29 = vld [vmem:[%s1407_s3 + $0x80] sm:$0xff] }
   0xb   :  { %181 = vmatpush.msra.mxu1 %v154_v12  ;;  %v148_v30 = vld [vmem:[%s1407_s3 + $0x30] sm:$0xff]  ;;  %v147_v31 = vld [vmem:[%s1407_s3 + $0x28] sm:$0xff]  ;;  %v146_v32 = vld [vmem:[%s1407_s3 + $0x20] sm:$0xff] }
   0xc   :  { %206 = vmatpush.msra.mxu2 %v168_v13  ;;  %v145_v33 = vld [vmem:[%s1407_s3 + $0x18] sm:$0xff]  ;;  %v144_v34 = vld [vmem:[%s1407_s3 + $0x10] sm:$0xff]  ;;  %v143_v35 = vld [vmem:[%s1407_s3 + $0x8] sm:$0xff]  ;;  %v953_v13 = vand.u32 127, %v37_v54 }
   0xd   :  { %182 = vmatpush.msra.mxu1 %v153_v14  ;;  %v142_v36 = vld [vmem:[%s1407_s3] sm:$0xff]  ;;  %v313_v37 = vld [vmem:[%s1410_s5 + $0x1f0] sm:$0xff]  ;;  %v302_v54 = vld [vmem:[%s1410_s5 + $0x198] sm:$0xff] }
   0xe   :  { %207 = vmatpush.msra.mxu2 %v167_v16  ;;  %v311_v38 = vld [vmem:[%s1410_s5 + $0x1e0] sm:$0xff]  ;;  %408 = vmatpush.msrb.mxu0 %v313_v37  ;;  %v309_v40 = vld [vmem:[%s1410_s5 + $0x1d0] sm:$0xff]  ;;  %v39_v16 = vadd.s32 8, %v924_v1  ;;  %vm72_vm5 = vcmp.lt.s32.totalorder %v953_v13, 64  ;;  %v290_v13 = vld [vmem:[%s1410_s5 + $0x138] sm:$0xff] }
   0xf   :  { %650 = vmatmul.msk.f32.gmra.mxu0 %vm82_vm0, %v74_v15  ;;  %183 = vmatpush.msra.mxu1 %v152_v17  ;;  %v680_v39 = vld [vmem:[%s1409_s2] ss:$0 sm:$0xff]  ;;  %v281_v43 = vld [vmem:[%s1410_s5 + $0xf0] sm:$0xff]  ;;  %vm643_vm0 = vcmask 1024  }
  0x10   :  { %208 = vmatpush.msra.mxu2 %v166_v18  ;;  %409 = vmatpush.msrb.mxu0 %v311_v38  ;;  %v307_v42 = vld [vmem:[%s1410_s5 + $0x1c0] sm:$0xff]  ;;  %v345_v45 = vld [vmem:[%s1410_s5 + $0x2f0] sm:$0xff] }
  0x11   :  { %184 = vmatpush.msra.mxu1 %v151_v24  ;;  %385 = vmatpush.msra.mxu3 %v281_v43  ;;  %v377_v46 = vld [vmem:[%s1410_s5 + $0x3f0] sm:$0xff]  ;;  %v279_v47 = vld [vmem:[%s1410_s5 + $0xe0] sm:$0xff] }
  0x12   :  { %209 = vmatpush.msra.mxu2 %v165_v19  ;;  %410 = vmatpush.msrb.mxu0 %v309_v40  ;;  %v305_v48 = vld [vmem:[%s1410_s5 + $0x1b0] sm:$0xff]  ;;  %v343_v49 = vld [vmem:[%s1410_s5 + $0x2e0] sm:$0xff] }
  0x13   :  { %185 = vmatpush.msra.mxu1 %v150_v26  ;;  %v375_v50 = vld [vmem:[%s1410_s5 + $0x3e0] sm:$0xff]  ;;  %386 = vmatpush.msra.mxu3 %v279_v47  ;;  %v277_v52 = vld [vmem:[%s1410_s5 + $0xd0] sm:$0xff]  ;;  %v314_v47 = vld [vmem:[%s1410_s5 + $0x1f8] sm:$0xff] }
  0x14   :  { %210 = vmatpush.msra.mxu2 %v164_v20  ;;  %411 = vmatpush.msrb.mxu0 %v307_v42  ;;  %v341_v53 = vld [vmem:[%s1410_s5 + $0x2d0] sm:$0xff]  ;;  %v303_v55 = vld [vmem:[%s1410_s5 + $0x1a0] sm:$0xff] }
  0x15   :  { %186 = vmatpush.msra.mxu1 %v149_v28  ;;  %v373_v56 = vld [vmem:[%s1410_s5 + $0x3d0] sm:$0xff]  ;;  %387 = vmatpush.msra.mxu3 %v277_v52  ;;  %v275_v58 = vld [vmem:[%s1410_s5 + $0xc0] sm:$0xff]  ;;  %v306_v52 = vld [vmem:[%s1410_s5 + $0x1b8] sm:$0xff] }
  0x16   :  { %211 = vmatpush.msra.mxu2 %v163_v21  ;;  %412 = vmatpush.msrb.mxu0 %v305_v48  ;;  %v339_v59 = vld [vmem:[%s1410_s5 + $0x2c0] sm:$0xff]  ;;  %v301_v60 = vld [vmem:[%s1410_s5 + $0x190] sm:$0xff] }
  0x17   :  { %187 = vmatpush.msra.mxu1 %v148_v30  ;;  %v371_v61 = vld [vmem:[%s1410_s5 + $0x3c0] sm:$0xff]  ;;  %v273_v62 = vld [vmem:[%s1410_s5 + $0xb0] sm:$0xff]  ;;  %388 = vmatpush.msra.mxu3 %v275_v58  ;;  %v991_v30 = vand.u32 7, %v39_v16 }
  0x18   :  { %212 = vmatpush.msra.mxu2 %v162_v22  ;;  %413 = vmatpush.msrb.mxu0 %v303_v55  ;;  %v337_v63 = vld [vmem:[%s1410_s5 + $0x2b0] sm:$0xff]  ;;  %v299_v2 = vld [vmem:[%s1410_s5 + $0x180] sm:$0xff]  ;;  %v300_v55 = vld [vmem:[%s1410_s5 + $0x188] sm:$0xff] }
  0x19   :  { %188 = vmatpush.msra.mxu1 %v147_v31  ;;  %v369_v3 = vld [vmem:[%s1410_s5 + $0x3b0] sm:$0xff]  ;;  %v271_v5 = vld [vmem:[%s1410_s5 + $0xa0] sm:$0xff]  ;;  %389 = vmatpush.msra.mxu3 %v273_v62  ;;  %vm65_vm6 = vcmp.ne.s32.totalorder %v991_v30, 0  ;;  %vm67_vm7 = vcmp.ne.s32.totalorder %v991_v30, 7  ;;  %vm69_vm10 = vcmp.lt.s32.totalorder %v991_v30, 6 }
  0x1a   :  { %213 = vmatpush.msra.mxu2 %v161_v23  ;;  %414 = vmatpush.msrb.mxu0 %v301_v60  ;;  %v335_v6 = vld [vmem:[%s1410_s5 + $0x2a0] sm:$0xff]  ;;  %v297_v8 = vld [vmem:[%s1410_s5 + $0x170] sm:$0xff] }
  0x1b   :  { %189 = vmatpush.msra.mxu1 %v146_v32  ;;  %v367_v9 = vld [vmem:[%s1410_s5 + $0x3a0] sm:$0xff]  ;;  %v269_v11 = vld [vmem:[%s1410_s5 + $0x90] sm:$0xff]  ;;  %390 = vmatpush.msra.mxu3 %v271_v5 }
  0x1c   :  { %214 = vmatpush.msra.mxu2 %v160_v25  ;;  %415 = vmatpush.msrb.mxu0 %v299_v2  ;;  %v333_v12 = vld [vmem:[%s1410_s5 + $0x290] sm:$0xff]  ;;  %v295_v14 = vld [vmem:[%s1410_s5 + $0x160] sm:$0xff] }
  0x1d   :  { %190 = vmatpush.msra.mxu1 %v145_v33  ;;  %v365_v17 = vld [vmem:[%s1410_s5 + $0x390] sm:$0xff]  ;;  %v267_v18 = vld [vmem:[%s1410_s5 + $0x80] sm:$0xff]  ;;  %391 = vmatpush.msra.mxu3 %v269_v11 }
  0x1e   :  { %215 = vmatpush.msra.mxu2 %v159_v27  ;;  %416 = vmatpush.msrb.mxu0 %v297_v8  ;;  %v293_v19 = vld [vmem:[%s1410_s5 + $0x150] sm:$0xff]  ;;  %v331_v24 = vld [vmem:[%s1410_s5 + $0x280] sm:$0xff] }
  0x1f   :  { %191 = vmatpush.msra.mxu1 %v144_v34  ;;  %v363_v25 = vld [vmem:[%s1410_s5 + $0x380] sm:$0xff]  ;;  %392 = vmatpush.msra.mxu3 %v267_v18  ;;  %v265_v27 = vld [vmem:[%s1410_s5 + $0x70] sm:$0xff]  ;;  %v288_v18 = vld [vmem:[%s1410_s5 + $0x128] sm:$0xff] }
  0x20   :  { %216 = vmatpush.msra.mxu2 %v158_v29  ;;  %417 = vmatpush.msrb.mxu0 %v295_v14  ;;  %v291_v26 = vld [vmem:[%s1410_s5 + $0x140] sm:$0xff]  ;;  %v361_v31 = vld [vmem:[%s1410_s5 + $0x370] sm:$0xff] }
  0x21   :  { %192 = vmatpush.msra.mxu1 %v143_v35  ;;  %v289_v34 = vld [vmem:[%s1410_s5 + $0x130] sm:$0xff]  ;;  %393 = vmatpush.msra.mxu3 %v265_v27  ;;  %v263_v37 = vld [vmem:[%s1410_s5 + $0x60] sm:$0xff]  ;;  %v1170_v27 = vld [vmem:[%s1410_s5 + $0x2d8] sm:$0xff] }
  0x22   :  { %454 = vmatpush.msrb.mxu2 %v377_v46  ;;  %418 = vmatpush.msrb.mxu0 %v293_v19  ;;  %v329_v35 = vld [vmem:[%s1410_s5 + $0x270] sm:$0xff]  ;;  %v359_v38 = vld [vmem:[%s1410_s5 + $0x360] sm:$0xff]  ;;  %v1140_v19 = vld [vmem:[%s1410_s5 + $0x2f8] sm:$0xff] }
  0x23   :  { %193 = vmatpush.msra.mxu1 %v142_v36  ;;  %v327_v40 = vld [vmem:[%s1410_s5 + $0x260] sm:$0xff]  ;;  %v285_v43 = vld [vmem:[%s1410_s5 + $0x110] sm:$0xff]  ;;  %394 = vmatpush.msra.mxu3 %v263_v37  ;;  %v1206_v37 = vld [vmem:[%s1410_s5 + $0x2a8] sm:$0xff] }
  0x24   :  { %455 = vmatpush.msrb.mxu2 %v375_v50  ;;  %419 = vmatpush.msrb.mxu0 %v291_v26  ;;  %v283_v46 = vld [vmem:[%s1410_s5 + $0x100] sm:$0xff]  ;;  %v310_v50 = vld [vmem:[%s1410_s5 + $0x1d8] sm:$0xff]  ;;  %v357_v58 = vld [vmem:[%s1410_s5 + $0x350] sm:$0xff] }
  0x25   :  { %431 = vmatpush.msrb.mxu1 %v345_v45  ;;  %v259_v60 = vld [vmem:[%s1410_s5 + $0x40] sm:$0xff]  ;;  %v321_v2 = vld [vmem:[%s1410_s5 + $0x230] sm:$0xff]  ;;  %v284_v26 = vld [vmem:[%s1410_s5 + $0x108] sm:$0xff] }
  0x26   :  { %456 = vmatpush.msrb.mxu2 %v373_v56  ;;  %420 = vmatpush.msrb.mxu0 %v289_v34  ;;  %v261_v56 = vld [vmem:[%s1410_s5 + $0x50] sm:$0xff]  ;;  %v355_v62 = vld [vmem:[%s1410_s5 + $0x340] sm:$0xff]  ;;  %v1194_v34 = vld [vmem:[%s1410_s5 + $0x2b8] sm:$0xff] }
  0x27   :  { %432 = vmatpush.msrb.mxu1 %v343_v49  ;;  %v312_v49 = vld [vmem:[%s1410_s5 + $0x1e8] sm:$0xff]  ;;  %395 = vmatpush.msra.mxu3 %v261_v56  ;;  %v255_v5 = vld [vmem:[%s1410_s5 + $0x20] sm:$0xff]  ;;  %v317_v11 = vld [vmem:[%s1410_s5 + $0x210] sm:$0xff] }
  0x28   :  { %457 = vmatpush.msrb.mxu2 %v371_v61  ;;  %v323_v61 = vld [vmem:[%s1410_s5 + $0x240] sm:$0xff]  ;;  %v356_v56 = vld [vmem:[%s1410_s5 + $0x348] sm:$0xff] }
  0x29   :  { %433 = vmatpush.msrb.mxu1 %v341_v53  ;;  %v304_v53 = vld [vmem:[%s1410_s5 + $0x1a8] sm:$0xff]  ;;  %396 = vmatpush.msra.mxu3 %v259_v60  ;;  %v351_v8 = vld [vmem:[%s1410_s5 + $0x320] sm:$0xff]  ;;  %v354_v60 = vld [vmem:[%s1410_s5 + $0x338] sm:$0xff] }
  0x2a   :  { %458 = vmatpush.msrb.mxu2 %v369_v3  ;;  %v353_v3 = vld [vmem:[%s1410_s5 + $0x330] sm:$0xff]  ;;  %v251_v14 = vld [vmem:[%s1410_s5] sm:$0xff] }
  0x2b   :  { %434 = vmatpush.msrb.mxu1 %v339_v59  ;;  %v298_v59 = vld [vmem:[%s1410_s5 + $0x178] sm:$0xff]  ;;  %v347_v16 = vld [vmem:[%s1410_s5 + $0x300] sm:$0xff] }
  0x2c   :  { %459 = vmatpush.msrb.mxu2 %v367_v9  ;;  %v292_v9 = vld [vmem:[%s1410_s5 + $0x148] sm:$0xff] }
  0x2d   :  { %435 = vmatpush.msrb.mxu1 %v337_v63  ;;  %v296_v63 = vld [vmem:[%s1410_s5 + $0x168] sm:$0xff] }
  0x2e   :  { %460 = vmatpush.msrb.mxu2 %v365_v17  ;;  %v282_v17 = vld [vmem:[%s1410_s5 + $0xf8] sm:$0xff] }
  0x2f   :  { %436 = vmatpush.msrb.mxu1 %v335_v6  ;;  %v319_v6 = vld [vmem:[%s1410_s5 + $0x220] sm:$0xff] }
  0x30   :  { %461 = vmatpush.msrb.mxu2 %v363_v25  ;;  %v278_v25 = vld [vmem:[%s1410_s5 + $0xd8] sm:$0xff] }
  0x31   :  { %437 = vmatpush.msrb.mxu1 %v333_v12  ;;  %v349_v12 = vld [vmem:[%s1410_s5 + $0x310] sm:$0xff] }
  0x32   :  { %462 = vmatpush.msrb.mxu2 %v361_v31  ;;  %v1182_v31 = vld [vmem:[%s1410_s5 + $0x2c8] sm:$0xff] }
  0x33   :  { %438 = vmatpush.msrb.mxu1 %v331_v24  ;;  %v376_v24 = vld [vmem:[%s1410_s5 + $0x3e8] sm:$0xff] }
  0x34   :  { %463 = vmatpush.msrb.mxu2 %v359_v38  ;;  %v368_v38 = vld [vmem:[%s1410_s5 + $0x3a8] sm:$0xff] }
  0x35   :  { %439 = vmatpush.msrb.mxu1 %v329_v35  ;;  %v370_v35 = vld [vmem:[%s1410_s5 + $0x3b8] sm:$0xff] }
  0x36   :  { %464 = vmatpush.msrb.mxu2 %v357_v58  ;;  %v258_v58 = vld [vmem:[%s1410_s5 + $0x38] sm:$0xff] }
  0x37   :  { %440 = vmatpush.msrb.mxu1 %v327_v40  ;;  %v1218_v40 = vld [vmem:[%s1410_s5 + $0x298] sm:$0xff] }
  0x38   :  { %465 = vmatpush.msrb.mxu2 %v355_v62  ;;  %v1305_v62 = vld [vmem:[%s1410_s5 + $0x228] sm:$0xff] }
  0x3a   :  { %466 = vmatpush.msrb.mxu2 %v353_v3 }
  0x3c   :  { %467 = vmatpush.msrb.mxu2 %v351_v8 }
  0x3e   :  { %468 = vmatpush.msrb.mxu2 %v349_v12 }
  0x40   :  { %469 = vmatpush.msrb.mxu2 %v347_v16 }
  0x84   :  { %v106_v41 = vpop.f32.mrf.mxu0 }
  0x85   :  { %v107_v44 = vadd.f32 %v680_v39, %v106_v41 }
  0x87   :  { %v112_v51 = vmul.f32 0.2, %v107_v44 }
  0x89   :  { %v903_v57 = vmax.f32 %v107_v44, %v112_v51  ;;  %v308_v51 = vld [vmem:[%s1410_s5 + $0x1c8] sm:$0xff] }
  0x8b   :  { %217 = vmatmul.f32.vlgmr.msra.gmra.mxu2 %v903_v57  ;;  %v116_v20 = vrot.slane %v903_v57, 7  ;;  %v127_v21 = vrot.slane %v903_v57, 1  ;;  %v325_v57 = vld [vmem:[%s1410_s5 + $0x250] sm:$0xff] }
  0x8c   :  { %v109_v0 = vpop.f32.mrf.mxu0  ;;  %441 = vmatpush.msrb.mxu1 %v325_v57  ;;  %v681_v57 = vld [vmem:[%s1411_s4] ss:$0 sm:$0xff] }
  0x8d   :  { %v110_v4 = vadd.f32 %v680_v39, %v109_v0  ;;  %v287_v39 = vld [vmem:[%s1410_s5 + $0x120] sm:$0xff]  ;;  %v257_v0 = vld [vmem:[%s1410_s5 + $0x30] sm:$0xff] }
  0x8e   :  { %421 = vmatpush.msrb.mxu0 %v287_v39  ;;  %442 = vmatpush.msrb.mxu1 %v323_v61  ;;  %v270_v39 = vld [vmem:[%s1410_s5 + $0x98] sm:$0xff]  ;;  %v256_v61 = vld [vmem:[%s1410_s5 + $0x28] sm:$0xff] }
  0x8f   :  { %v113_v10 = vmul.f32 0.2, %v110_v4  ;;  %397 = vmatpush.msra.mxu3 %v257_v0 }
  0x90   :  { %422 = vmatpush.msrb.mxu0 %v285_v43  ;;  %443 = vmatpush.msrb.mxu1 %v321_v2  ;;  %v1230_v43 = vld [vmem:[%s1410_s5 + $0x288] sm:$0xff] }
  0x91   :  { %v115_v15 = vmax.f32 %v110_v4, %v113_v10  ;;  %v294_v4 = vld [vmem:[%s1410_s5 + $0x158] sm:$0xff]  ;;  %398 = vmatpush.msra.mxu3 %v255_v5  ;;  %v253_v10 = vld [vmem:[%s1410_s5 + $0x10] sm:$0xff] }
  0x92   :  { %423 = vmatpush.msrb.mxu0 %v283_v46  ;;  %444 = vmatpush.msrb.mxu1 %v319_v6  ;;  %v1242_v46 = vld [vmem:[%s1410_s5 + $0x278] sm:$0xff] }
  0x93   :  { %v117_v22 = vrot.slane %v115_v15, 7  ;;  %v128_v23 = vrot.slane %v115_v15, 1  ;;  %220 = vmatmul.f32.gmra.mxu2 %v115_v15  ;;  %399 = vmatpush.msra.mxu3 %v253_v10  ;;  %v315_v15 = vld [vmem:[%s1410_s5 + $0x200] sm:$0xff]  ;;  %v318_v5 = vld [vmem:[%s1410_s5 + $0x218] sm:$0xff]  ;;  %v316_v10 = vld [vmem:[%s1410_s5 + $0x208] sm:$0xff] }
  0x94   :  { %500 = vmatpush.msra.mxu0 %v314_v47  ;;  %445 = vmatpush.msrb.mxu1 %v317_v11  ;;  %v362_v47 = vld [vmem:[%s1410_s5 + $0x378] sm:$0xff]  ;;  %v348_v11 = vld [vmem:[%s1410_s5 + $0x308] sm:$0xff] }
  0x95   :  { %v120_v28 = vsel %vm118_vm3, %v117_v22, %v116_v20  ;;  %v130_v29 = vsel %vm129_vm4, %v127_v21, %v128_v23  ;;  %v119_v41 = vsel %vm118_vm3, %v116_v20, %v117_v22  ;;  %v131_v42 = vsel %vm129_vm4, %v128_v23, %v127_v21  ;;  %400 = vmatpush.msra.mxu3 %v251_v14  ;;  %v378_v20 = vld [vmem:[%s1410_s5 + $0x3f8] sm:$0xff]  ;;  %v280_v21 = vld [vmem:[%s1410_s5 + $0xe8] sm:$0xff] }
  0x96   :  { %v125_v32 = vsel %vm64_vm1, %v120_v28, 0.0  ;;  %v136_v33 = vsel %vm66_vm2, %v130_v29, 0.0  ;;  %v126_v44 = vsel %vm65_vm6, %v119_v41, 0.0  ;;  %v137_v45 = vsel %vm67_vm7, %v131_v42, 0.0  ;;  %501 = vmatpush.msra.mxu0 %v312_v49  ;;  %446 = vmatpush.msrb.mxu1 %v315_v15  ;;  %v286_v22 = vld [vmem:[%s1410_s5 + $0x118] sm:$0xff]  ;;  %v1155_v23 = vld [vmem:[%s1410_s5 + $0x2e8] sm:$0xff] }
  0x97   :  { %v140_v36 = vsel %vm72_vm5, %v125_v32, %v136_v33  ;;  %v141_v48 = vsel %vm72_vm5, %v126_v44, %v137_v45  ;;  %477 = vmatpush.msrb.mxu3 %v282_v17  ;;  %546 = vmatpush.msra.mxu2 %v378_v20  ;;  %v374_v28 = vld [vmem:[%s1410_s5 + $0x3d8] sm:$0xff]  ;;  %v276_v29 = vld [vmem:[%s1410_s5 + $0xc8] sm:$0xff] }
  0x98   :  { %194 = vmatmul.f32.vlgmr.msra.gmra.mxu1 %v140_v36  ;;  %502 = vmatpush.msra.mxu0 %v310_v50  ;;  %v372_v32 = vld [vmem:[%s1410_s5 + $0x3c8] sm:$0xff]  ;;  %v274_v33 = vld [vmem:[%s1410_s5 + $0xb8] sm:$0xff] }
  0x99   :  { %664 = vmatpush.msra.mxu1 %v1140_v19  ;;  %478 = vmatpush.msrb.mxu3 %v280_v21  ;;  %v272_v36 = vld [vmem:[%s1410_s5 + $0xa8] sm:$0xff]  ;;  %v366_v41 = vld [vmem:[%s1410_s5 + $0x398] sm:$0xff] }
  0x9a   :  { %503 = vmatpush.msra.mxu0 %v308_v51  ;;  %547 = vmatpush.msra.mxu2 %v376_v24  ;;  %v268_v42 = vld [vmem:[%s1410_s5 + $0x88] sm:$0xff]  ;;  %v266_v45 = vld [vmem:[%s1410_s5 + $0x78] sm:$0xff] }
  0x9b   :  { %665 = vmatpush.msra.mxu1 %v1155_v23  ;;  %479 = vmatpush.msrb.mxu3 %v278_v25  ;;  %v364_v44 = vld [vmem:[%s1410_s5 + $0x388] sm:$0xff]  ;;  %v262_v51 = vld [vmem:[%s1410_s5 + $0x58] sm:$0xff] }
  0x9c   :  { %504 = vmatpush.msra.mxu0 %v306_v52  ;;  %548 = vmatpush.msra.mxu2 %v374_v28  ;;  %v1254_v49 = vld [vmem:[%s1410_s5 + $0x268] sm:$0xff]  ;;  %v1266_v52 = vld [vmem:[%s1410_s5 + $0x258] sm:$0xff] }
  0x9d   :  { %666 = vmatpush.msra.mxu1 %v1170_v27  ;;  %480 = vmatpush.msrb.mxu3 %v276_v29  ;;  %v360_v50 = vld [vmem:[%s1410_s5 + $0x368] sm:$0xff]  ;;  %v350_v6 = vld [vmem:[%s1410_s5 + $0x318] sm:$0xff] }
  0x9e   :  { %505 = vmatpush.msra.mxu0 %v304_v53  ;;  %549 = vmatpush.msra.mxu2 %v372_v32  ;;  %v358_v53 = vld [vmem:[%s1410_s5 + $0x358] sm:$0xff] }
  0x9f   :  { %667 = vmatpush.msra.mxu1 %v1182_v31  ;;  %481 = vmatpush.msrb.mxu3 %v274_v33 }
  0xa0   :  { %197 = vmatmul.f32.gmra.mxu1 %v141_v48  ;;  %506 = vmatpush.msra.mxu0 %v302_v54  ;;  %v264_v48 = vld [vmem:[%s1410_s5 + $0x68] sm:$0xff] }
  0xa1   :  { %668 = vmatpush.msra.mxu1 %v1194_v34  ;;  %550 = vmatpush.msra.mxu2 %v370_v35  ;;  %v260_v54 = vld [vmem:[%s1410_s5 + $0x48] sm:$0xff] }
  0xa2   :  { %507 = vmatpush.msra.mxu0 %v300_v55  ;;  %482 = vmatpush.msrb.mxu3 %v272_v36  ;;  %v1278_v55 = vld [vmem:[%s1410_s5 + $0x248] sm:$0xff] }
  0xa3   :  { %669 = vmatpush.msra.mxu1 %v1206_v37  ;;  %551 = vmatpush.msra.mxu2 %v368_v38  ;;  %v379_v38 = vld [vmem:[%s1412_s6] sm:$0x3] }
  0xa4   :  { %508 = vmatpush.msra.mxu0 %v298_v59  ;;  %483 = vmatpush.msrb.mxu3 %v270_v39  ;;  %v1293_v59 = vld [vmem:[%s1410_s5 + $0x238] sm:$0xff]  ;;  %v381_v7 = vperm.slane %v379_v38, 0 }
  0xa5   :  { %670 = vmatpush.msra.mxu1 %v1218_v40  ;;  %552 = vmatpush.msra.mxu2 %v366_v41 }
  0xa6   :  { %509 = vmatpush.msra.mxu0 %v296_v63  ;;  %484 = vmatpush.msrb.mxu3 %v268_v42  ;;  %v352_v63 = vld [vmem:[%s1410_s5 + $0x328] sm:$0xff]  ;;  %v382_v42 = vperm.slane %v379_v38, 1 }
  0xa7   :  { %671 = vmatpush.msra.mxu1 %v1230_v43  ;;  %553 = vmatpush.msra.mxu2 %v364_v44 }
  0xa8   :  { %510 = vmatpush.msra.mxu0 %v294_v4  ;;  %485 = vmatpush.msrb.mxu3 %v266_v45  ;;  %v254_v4 = vld [vmem:[%s1410_s5 + $0x18] sm:$0xff] }
  0xa9   :  { %672 = vmatpush.msra.mxu1 %v1242_v46  ;;  %554 = vmatpush.msra.mxu2 %v362_v47 }
  0xaa   :  { %511 = vmatpush.msra.mxu0 %v292_v9  ;;  %486 = vmatpush.msrb.mxu3 %v264_v48  ;;  %v252_v9 = vld [vmem:[%s1410_s5 + $0x8] sm:$0xff] }
  0xab   :  { %673 = vmatpush.msra.mxu1 %v1254_v49  ;;  %555 = vmatpush.msra.mxu2 %v360_v50 }
  0xac   :  { %512 = vmatpush.msra.mxu0 %v290_v13  ;;  %487 = vmatpush.msrb.mxu3 %v262_v51 }
  0xad   :  { %674 = vmatpush.msra.mxu1 %v1266_v52  ;;  %556 = vmatpush.msra.mxu2 %v358_v53 }
  0xae   :  { %513 = vmatpush.msra.mxu0 %v288_v18  ;;  %488 = vmatpush.msrb.mxu3 %v260_v54 }
  0xaf   :  { %675 = vmatpush.msra.mxu1 %v1278_v55  ;;  %557 = vmatpush.msra.mxu2 %v356_v56 }
  0xb0   :  { %514 = vmatpush.msra.mxu0 %v286_v22  ;;  %489 = vmatpush.msrb.mxu3 %v258_v58 }
  0xb1   :  { %676 = vmatpush.msra.mxu1 %v1293_v59  ;;  %558 = vmatpush.msra.mxu2 %v354_v60 }
  0xb2   :  { %515 = vmatpush.msra.mxu0 %v284_v26  ;;  %490 = vmatpush.msrb.mxu3 %v256_v61 }
  0xb3   :  { %677 = vmatpush.msra.mxu1 %v1305_v62  ;;  %559 = vmatpush.msra.mxu2 %v352_v63 }
  0xb4   :  { %491 = vmatpush.msrb.mxu3 %v254_v4 }
  0xb5   :  { %678 = vmatpush.msra.mxu1 %v318_v5  ;;  %560 = vmatpush.msra.mxu2 %v350_v6  ;;  %v580_v6 = vld [vmem:[%s1413_s7 + $0x18] sm:$0xff] }
  0xb6   :  { %492 = vmatpush.msrb.mxu3 %v252_v9 }
  0xb7   :  { %679 = vmatpush.msra.mxu1 %v316_v10  ;;  %561 = vmatpush.msra.mxu2 %v348_v11 }
 0x10e   :  { %v218_v0 = vpop.f32.mrf.mxu2 }
 0x115   :  { %v195_v2 = vpop.f32.mrf.mxu1 }
 0x116   :  { %v196_v3 = vadd.f32 %v681_v57, %v195_v2  ;;  %v221_v16 = vpop.f32.mrf.mxu2 }
 0x118   :  { %v219_v8 = vadd.f32 %v218_v0, %v196_v3 }
 0x11a   :  { %v224_v12 = vmul.f32 0.2, %v219_v8 }
 0x11c   :  { %v226_v13 = vmax.f32 %v219_v8, %v224_v12 }
 0x11d   :  { %v198_v14 = vpop.f32.mrf.mxu1 }
 0x11e   :  { %v199_v15 = vadd.f32 %v681_v57, %v198_v14  ;;  %424 = vmatmul.f32.vlgmr.msrb.gmra.mxu0 %v226_v13  ;;  %v228_v21 = vrot.slane %v226_v13, 7  ;;  %v234_v22 = vrot.slane %v226_v13, 1  ;;  %v240_v26 = vrot.slane %v226_v13, 2 }
 0x11f   :  { %523 = vmatpush.msrb.mxu0 %v1140_v19 }
 0x120   :  { %v222_v17 = vadd.f32 %v221_v16, %v199_v15  ;;  %v578_v15 = vld [vmem:[%s1413_s7 + $0x8] sm:$0xff] }
 0x121   :  { %524 = vmatpush.msrb.mxu0 %v1155_v23 }
 0x122   :  { %v225_v18 = vmul.f32 0.2, %v222_v17 }
 0x123   :  { %525 = vmatpush.msrb.mxu0 %v1170_v27 }
 0x124   :  { %v227_v20 = vmax.f32 %v222_v17, %v225_v18  ;;  %v577_v17 = vld [vmem:[%s1413_s7] sm:$0xff] }
 0x125   :  { %526 = vmatpush.msrb.mxu0 %v1182_v31 }
 0x126   :  { %427 = vmatmul.f32.gmra.mxu0 %v227_v20  ;;  %v229_v24 = vrot.slane %v227_v20, 7  ;;  %v235_v25 = vrot.slane %v227_v20, 1  ;;  %v241_v28 = vrot.slane %v227_v20, 2 }
 0x127   :  { %527 = vmatpush.msrb.mxu0 %v1194_v34 }
 0x128   :  { %v231_v19 = vsel %vm118_vm3, %v229_v24, %v228_v21  ;;  %v236_v23 = vsel %vm129_vm4, %v234_v22, %v235_v25  ;;  %v243_v27 = vsel %vm242_vm8, %v240_v26, %v241_v28  ;;  %v230_v29 = vsel %vm118_vm3, %v228_v21, %v229_v24 }
 0x129   :  { %651 = vmatmul.msk.f32.vlgmr.msra.gmra.mxu3 %vm64_vm1, %v231_v19  ;;  %653 = vmatmul.msk.f32.vlgmr.msrb.gmra.mxu1 %vm66_vm2, %v236_v23  ;;  %v237_v31 = vsel %vm129_vm4, %v235_v25, %v234_v22  ;;  %v244_v32 = vsel %vm242_vm8, %v241_v28, %v240_v26  ;;  %v15_v22 = vstv %s1414_s9  ;;  %v591_v25 = vld [vmem:[%s1415_s8] sm:$0x3] }
 0x12a   :  { %655 = vmatmul.msk.f32.vlgmr.msrb.gmra.mxu2 %vm68_vm9, %v243_v27  ;;  %528 = vmatpush.msrb.mxu0 %v1206_v37  ;;  %16 = vst [vmem:[#allocation2] sm:$0x1] %v15_v22 }
 0x12c   :  { %529 = vmatpush.msrb.mxu0 %v1218_v40 }
 0x12e   :  { %530 = vmatpush.msrb.mxu0 %v1230_v43 }
 0x12f   :  { %516 = vmatmul.f32.vlgmr.msra.gmra.mxu0 %v226_v13 }
 0x130   :  { %531 = vmatpush.msrb.mxu0 %v1242_v46 }
 0x131   :  { %652 = vmatmul.msk.f32.gmra.mxu3 %vm65_vm6, %v230_v29  ;;  %654 = vmatmul.msk.f32.gmra.mxu1 %vm67_vm7, %v237_v31  ;;  %v682_v28 = vld [vmem:[#allocation2] ss:$0 sm:$0xff] }
 0x132   :  { %656 = vmatmul.msk.f32.gmra.mxu2 %vm69_vm10, %v244_v32  ;;  %532 = vmatpush.msrb.mxu0 %v1254_v49 }
 0x134   :  { %533 = vmatpush.msrb.mxu0 %v1266_v52 }
 0x136   :  { %534 = vmatpush.msrb.mxu0 %v1278_v55 }
 0x137   :  { %519 = vmatmul.f32.gmra.mxu0 %v227_v20 }
 0x138   :  { %535 = vmatpush.msrb.mxu0 %v1293_v59 }
 0x139   :  { %657 = vmatmul.msk.f32.vlgmr.msrb.gmra.mxu3 %vm64_vm1, %v231_v19  ;;  %660 = vmatmul.msk.f32.vlgmr.msra.gmra.mxu1 %vm67_vm7, %v237_v31 }
 0x13a   :  { %536 = vmatpush.msrb.mxu0 %v1305_v62  ;;  %661 = vmatmul.msk.f32.vlgmr.msra.gmra.mxu2 %vm68_vm9, %v243_v27 }
 0x13c   :  { %537 = vmatpush.msrb.mxu0 %v318_v5  ;;  %v579_v5 = vld [vmem:[%s1413_s7 + $0x10] sm:$0xff] }
 0x13e   :  { %538 = vmatpush.msrb.mxu0 %v316_v10 }
 0x13f   :  { %659 = vmatmul.msk.f32.vlgmr.msrb.gmra.mxu0 %vm66_vm2, %v236_v23 }
 0x141   :  { %658 = vmatmul.msk.f32.gmra.mxu3 %vm65_vm6, %v230_v29 }
 0x142   :  { %662 = vmatmul.msk.f32.gmra.mxu2 %vm69_vm10, %v244_v32 }
 0x19b   :  { %v425_v1 = vpop.f32.mrf.mxu0 }
 0x1a3   :  { %v428_v33 = vpop.f32.mrf.mxu0 }
 0x1a6   :  { %v448_v37 = vpop.f32.mrf.mxu1 }
 0x1ac   :  { %v402_v34 = vpop.f32.mrf.mxu3  ;;  %v517_v36 = vpop.f32.mrf.mxu0 }
 0x1ad   :  { %v471_v35 = vpop.f32.mrf.mxu2  ;;  %v403_v48 = vadd.f32 %v402_v34, %v381_v7 }
 0x1ae   :  { %v451_v30 = vpop.f32.mrf.mxu1 }
 0x1af   :  { %v426_v52 = vadd.f32 %v425_v1, %v403_v48 }
 0x1b1   :  { %v449_v59 = vadd.f32 %v448_v37, %v426_v52 }
 0x1b3   :  { %v472_v2 = vadd.f32 %v471_v35, %v449_v59 }
 0x1b4   :  { %v405_v39 = vpop.f32.mrf.mxu3  ;;  %v520_v43 = vpop.f32.mrf.mxu0 }
 0x1b5   :  { %v474_v40 = vpop.f32.mrf.mxu2  ;;  %v406_v41 = vadd.f32 %v405_v39, %v381_v7  ;;  %v569_v10 = vmul.f32 0.2, %v472_v2 }
 0x1b6   :  { %v543_v58 = vpop.f32.mrf.mxu1 }
 0x1b7   :  { %v429_v45 = vadd.f32 %v428_v33, %v406_v41  ;;  %v573_v16 = vmax.f32 %v472_v2, %v569_v10 }
 0x1b9   :  { %v452_v49 = vadd.f32 %v451_v30, %v429_v45  ;;  %v581_v20 = vmul.f32 %v577_v17, %v573_v16 }
 0x1bb   :  { %v475_v53 = vadd.f32 %v474_v40, %v452_v49 }
 0x1bc   :  { %v494_v44 = vpop.f32.mrf.mxu3  ;;  %v540_v55 = vpop.f32.mrf.mxu0 }
 0x1bd   :  { %v495_v46 = vadd.f32 %v494_v44, %v382_v42  ;;  %v563_v47 = vpop.f32.mrf.mxu2  ;;  %v571_v60 = vmul.f32 0.2, %v475_v53 }
 0x1bf   :  { %v518_v50 = vadd.f32 %v517_v36, %v495_v46  ;;  %v575_v3 = vmax.f32 %v475_v53, %v571_v60 }
 0x1c1   :  { %v541_v56 = vadd.f32 %v540_v55, %v518_v50  ;;  %v583_v11 = vmul.f32 %v579_v5, %v575_v3 }
 0x1c3   :  { %v564_v63 = vadd.f32 %v563_v47, %v541_v56 }
 0x1c4   :  { %v497_v51 = vpop.f32.mrf.mxu3 }
 0x1c5   :  { %v498_v54 = vadd.f32 %v497_v51, %v382_v42  ;;  %v566_v62 = vpop.f32.mrf.mxu2  ;;  %v570_v8 = vmul.f32 0.2, %v564_v63 }
 0x1c7   :  { %v521_v57 = vadd.f32 %v520_v43, %v498_v54  ;;  %v574_v13 = vmax.f32 %v564_v63, %v570_v8 }
 0x1c9   :  { %v544_v61 = vadd.f32 %v543_v58, %v521_v57  ;;  %v582_v18 = vmul.f32 %v578_v15, %v574_v13 }
 0x1cb   :  { %v567_v0 = vadd.f32 %v566_v62, %v544_v61  ;;  %v585_v21 = vadd.f32 %v582_v18, %v581_v20 }
 0x1cd   :  { %v572_v4 = vmul.f32 0.2, %v567_v0 }
 0x1cf   :  { %v576_v9 = vmax.f32 %v567_v0, %v572_v4 }
 0x1d1   :  { %v584_v12 = vmul.f32 %v580_v6, %v576_v9 }
 0x1d3   :  { %v588_v14 = vadd.f32 %v584_v12, %v583_v11 }
 0x1d5   :  { %589 = vadd.xlane.f32.xlu0 %v588_v14 }
 0x1dd   :  { %586 = vadd.xlane.f32.xlu0 %v585_v21 }
 0x248   :  { %v590_v24 = vpop.xlane.xlu0 %589 }
 0x249   :  { %614 = vmatpush.msra.mxu3 %v590_v24 }
 0x250   :  { %v587_v26 = vpop.xlane.xlu0 %586 }
 0x251   :  { %615 = vmatpush.msra.mxu3 %v587_v26 }
 0x252   :  { %663 = vmatmul.msk.f32.vlgmr.msra.gmra.mxu3 %vm596_vm11, %v591_v25 }
 0x2d5   :  { %v617_v19 = vpop.f32.mrf.mxu3 }
 0x2d6   :  { %v618_v23 = vadd.f32 %v682_v28, %v617_v19 }
 0x2d8   :  { %v620_v27 = vand.u32 2147483647, %v618_v23  ;;  %vm624_vm1 = vcmp.ge.f32.partialorder %v618_v23, 0.0 }
 0x2da   :  { %v621_v29 = vsub.f32 0.0, %v620_v27 }
 0x2dc   :  { %v622_v31 = vmul.f32 1.442695, %v621_v29 }
 0x2de   :  { %683 = vpow2.f32 %v622_v31 }
 0x2e4   :  { %v684_v32 = vpop.eup %683 }
 0x2e5   :  { %v625_v1 = vadd.f32 1.0, %v684_v32 }
 0x2e7   :  { %685 = vrcp.f32 %v625_v1  ;;  %v637_v36 = vand.u32 2147483648, %v625_v1  ;;  %v635_v38 = vand.u32 2147483647, %v625_v1  ;;  %vm631_vm13 = vweird.f32 %v625_v1 }
 0x2e9   :  { %v638_v40 = vor.u32 1.1754944e-38, %v637_v36  ;;  %vm636_vm15 = vcmp.eq.f32.partialorder %v635_v38, 8.507059e+37 }
 0x2ed   :  { %v686_v33 = vpop.eup %685 }
 0x2ee   :  { %v627_v34 = vmul.f32 %v686_v33, %v625_v1  ;;  %vm632_vm12 = vweird.f32 %v686_v33 }
 0x2ef   :  { %vm633_vm14 = vmor %vm631_vm13, %vm632_vm12 }
 0x2f0   :  { %v628_v35 = vsub.f32 1.0, %v627_v34 }
 0x2f2   :  { %v629_v37 = vmul.f32 %v686_v33, %v628_v35 }
 0x2f4   :  { %v630_v39 = vadd.f32 %v686_v33, %v629_v37 }
 0x2f6   :  { %v634_v7 = vsel %vm633_vm14, %v686_v33, %v630_v39 }
 0x2f7   :  { %v639_v41 = vsel %vm636_vm15, %v638_v40, %v634_v7 }
 0x2f8   :  { %v641_v42 = vmul.f32 %v684_v32, %v639_v41 }
 0x2fa   :  { %v642_v43 = vsel %vm624_vm1, %v639_v41, %v641_v42 }
 0x2fb   :  { %644 = vst.msk [vmem:[%s1416_s10] sm:$0x3] %vm643_vm0, %v642_v43 }

</bundles_post_ra>
